<compile_context>
chip_gen: v5e
topology: v5e:2x2
jax: 0.10.0
libtpu: 0.0.40
codegen_flags: <defaults>
</compile_context>

<pallas_src>
from collections import deque

import numpy as np
import jax
import jax.numpy as jnp
from jax.experimental import pallas as pl
from jax.experimental.pallas import tpu as pltpu


# --------------------------------------------------------------------------------------
# Host-side hypergraph construction (graph preprocessing; no Pallas equivalent).
# TODO(synk): Girvan-Newman community detection is host-side Python (networkx in the
# reference); reimplemented in pure Python below, it is not part of the TPU kernels.
# --------------------------------------------------------------------------------------
def _edge_betweenness(adj, nodes):
    eb = {}
    for u in nodes:
        for v in adj[u]:
            if u < v:
                eb[(u, v)] = 0.0
    for s in nodes:
        stack = []
        pred = {v: [] for v in nodes}
        sigma = dict.fromkeys(nodes, 0.0); sigma[s] = 1.0
        dist = dict.fromkeys(nodes, -1); dist[s] = 0
        q = deque([s])
        while q:
            v = q.popleft(); stack.append(v)
            for w in adj[v]:
                if dist[w] < 0:
                    dist[w] = dist[v] + 1
                    q.append(w)
                if dist[w] == dist[v] + 1:
                    sigma[w] += sigma[v]
                    pred[w].append(v)
        delta = dict.fromkeys(nodes, 0.0)
        while stack:
            w = stack.pop()
            for v in pred[w]:
                c = sigma[v] / sigma[w] * (1.0 + delta[w])
                key = (v, w) if v < w else (w, v)
                eb[key] += c
                delta[v] += c
    return eb


def _connected_components(adj, nodes):
    seen, comps = set(), []
    for s in nodes:
        if s in seen:
            continue
        comp, stack = set(), [s]
        while stack:
            v = stack.pop()
            if v in comp:
                continue
            comp.add(v); seen.add(v)
            stack.extend(adj[v] - comp)
        comps.append(comp)
    return comps


def _girvan_newman_top_level(adj, nodes):
    adj = {n: set(adj[n]) for n in nodes}
    num_edges = sum(len(v) for v in adj.values()) // 2
    comps = _connected_components(adj, nodes)
    if num_edges == 0:
        return comps
    orig = len(comps)
    while len(comps) <= orig:
        eb = _edge_betweenness(adj, nodes)
        u, v = max(eb, key=eb.get)
        adj[u].discard(v); adj[v].discard(u)
        comps = _connected_components(adj, nodes)
    return comps


def build_hypergraph_from_graph(edge_index, num_nodes):
    edge_list = [tuple(int(a) for a in e) for e in np.asarray(edge_index).T.tolist()]
    if len(edge_list) == 0:
        if num_nodes > 1:
            edge_list = [(i, j) for i in range(num_nodes) for j in range(i + 1, num_nodes)]
        elif num_nodes == 1:
            edge_list = [(0, 0)]
    nodes = sorted({u for e in edge_list for u in e})
    adj = {n: set() for n in nodes}
    for u, v in edge_list:
        if u != v:
            adj[u].add(v); adj[v].add(u)
    try:
        communities = _girvan_newman_top_level(adj, nodes)
        partition = {node: idx for idx, comm in enumerate(communities) for node in comm}
    except Exception:
        partition = {node: 0 for node in nodes}
    comms = {}
    for node, cid in partition.items():
        comms.setdefault(cid, []).append(node)
    pairs = []
    for _, cnodes in comms.items():
        if len(cnodes) > 1:
            for i in range(len(cnodes)):
                for j in range(i + 1, len(cnodes)):
                    pairs.append([cnodes[i], cnodes[j]])
    if len(pairs) == 0:
        for i in range(num_nodes):
            for j in range(i + 1, num_nodes):
                pairs.append([i, j])
    # (2, P): row 0 = node index, row 1 = hyperedge index (matches the reference module)
    return np.asarray(pairs, dtype=np.int64).T


# --------------------------------------------------------------------------------------
# Precompute (XLA): P = D^-1 H B^-1 H^T, shared by both HypergraphConv layers.
# --------------------------------------------------------------------------------------
def _round_up(v, m):
    return -(-v // m) * m


def hypergraph_propagation_matrix(H):
    """P = D^-1 H B^-1 H^T from a dense (N, E) incidence matrix."""
    Hf = jnp.asarray(H, jnp.float32)
    deg_n = jnp.sum(Hf, axis=1, keepdims=True)            # node degrees   (N, 1)
    deg_e = jnp.sum(Hf, axis=0, keepdims=True)            # hyperedge degs (1, E)
    dinv = jnp.where(deg_n > 0, 1.0 / deg_n, 0.0)
    binv = jnp.where(deg_e > 0, 1.0 / deg_e, 0.0)
    return jax.lax.dot_general(dinv * Hf, Hf * binv,
                               dimension_numbers=(((1,), (1,)), ((), ())),
                               precision=jax.lax.Precision.HIGHEST)


def _vmem_capacity_bytes():
    """Per-core VMEM of the current TPU generation (64 MiB on v7x, 128 MiB v5e/v6e)."""
    try:
        info = pltpu.get_tpu_info()
        cap = getattr(info, "vmem_capacity_bytes", None)
        if cap:
            return int(cap)
    except Exception:
        pass
    return 64 * 1024 * 1024          # conservative default (v7x-sized)


# --------------------------------------------------------------------------------------
# Fused path: one pallas_call, P resident in VMEM, both conv layers + PReLU in one body.
# --------------------------------------------------------------------------------------
def _fused_kernel(p_ref, xw1_ref, x_ref, w2_ref, b1_ref, b2_ref, a_ref, o_ref):
    a = a_ref[0]                                          # PReLU slope (scalar, SMEM)
    # layer 1: z1 = P @ (x @ W1) + b1 ; y1 = PReLU(z1)   (bf16 MXU, f32 accumulate)
    z1 = jnp.dot(p_ref[...], xw1_ref[...],
                 preferred_element_type=jnp.float32) + b1_ref[...]
    y1 = jnp.where(z1 >= 0.0, z1, a * z1).astype(jnp.bfloat16)   # stays in VMEM
    # Theta of layer 2 applied before the second propagation ((P@Y)@W == P@(Y@W))
    yw2 = jnp.dot(y1, w2_ref[...],
                  preferred_element_type=jnp.float32).astype(jnp.bfloat16)
    # layer 2: z2 = P @ (y1 @ W2) + b2 + x ; out = PReLU(z2)
    z2 = (jnp.dot(p_ref[...], yw2, preferred_element_type=jnp.float32)
          + b2_ref[...] + x_ref[...])
    # NOTE: padded rows (i >= N) hold PReLU(b2) garbage; P's padded columns are zero so
    # they never reach valid rows, and the final [:N, :F] slice drops them.
    o_ref[...] = jnp.where(z2 >= 0.0, z2, a * z2).astype(o_ref.dtype)


def _fused_forward(pre, xw1_bf, x_pad):
    n_pad, f_pad = x_pad.shape
    p_bytes = 2 * n_pad * n_pad
    limit = min(int(0.75 * pre["cap"]),
                max(int(1.5 * (p_bytes + 16 * n_pad * f_pad * 4)), 32 * 1024 * 1024))
    vmem = lambda: pl.BlockSpec(memory_space=pltpu.MemorySpace.VMEM)
    smem = pl.BlockSpec(memory_space=pltpu.MemorySpace.SMEM)
    return pl.pallas_call(
        _fused_kernel,
        out_shape=jax.ShapeDtypeStruct((n_pad, f_pad), jnp.float32),
        in_specs=[vmem(), vmem(), vmem(), vmem(), vmem(), vmem(), smem],
        out_specs=vmem(),
        compiler_params=pltpu.CompilerParams(vmem_limit_bytes=limit),
    )(pre["p_bf"], xw1_bf, x_pad, pre["w2_bf"], pre["b1"], pre["b2"], pre["a"])


# --------------------------------------------------------------------------------------
# Streamed fallback (large P): one pallas_call per conv layer, grid over row tiles only,
# Y@Theta resident (fetched once), P streamed as full row stripes.
# --------------------------------------------------------------------------------------
def _make_streamed_kernel(add_residual):
    def kernel(p_ref, yw_ref, b_ref, a_ref, *rest):
        if add_residual:
            res_ref, o_ref = rest
        else:
            (o_ref,) = rest
        z = jnp.dot(p_ref[...], yw_ref[...],
                    preferred_element_type=jnp.float32) + b_ref[...]
        if add_residual:
            z = z + res_ref[...]
        a = a_ref[0]
        o_ref[...] = jnp.where(z >= 0.0, z, a * z).astype(o_ref.dtype)
    return kernel


def _choose_row_tile(n_pad, vmem_cap):
    """Largest power-of-two row tile whose double-buffered bf16 P row stripe stays
    under ~1/4 of this generation's VMEM (so it always divides the padded N)."""
    budget = max(vmem_cap // 4, 4 * 1024 * 1024)
    tm = 512
    while tm > 8 and 2 * tm * n_pad * 2 > budget:
        tm //= 2
    return min(tm, n_pad)


def _streamed_vmem_limit(tm, n_pad, f_pad, with_residual, out_itemsize, vmem_cap):
    bf16, f32 = 2, 4
    tot = 2 * tm * n_pad * bf16                 # P row stripe (double-buffered)
    tot += 2 * n_pad * f_pad * bf16             # resident Y@Theta
    tot += 2 * f_pad * f32                      # bias row
    if with_residual:
        tot += 2 * tm * f_pad * f32             # residual tile
    tot += 2 * tm * f_pad * out_itemsize        # output tile
    return min(max(3 * tot, 16 * 1024 * 1024), int(0.75 * vmem_cap))


def _streamed_conv_act(p_bf, yw_bf, bias, a_smem, residual, out_dtype, tm, vmem_cap):
    """out = PReLU(P @ YW + bias [+ residual]); YW = Y @ Theta precomputed (prologue)."""
    n_pad = p_bf.shape[0]
    f_pad = yw_bf.shape[1]
    grid = (n_pad // tm,)                       # row tiles only: purely parallel

    in_specs = [
        pl.BlockSpec((tm, n_pad), lambda i: (i, 0)),            # P row stripe (bf16)
        pl.BlockSpec((n_pad, f_pad), lambda i: (0, 0)),         # Y@Theta resident (bf16)
        pl.BlockSpec((1, f_pad), lambda i: (0, 0)),             # bias (f32)
        pl.BlockSpec(memory_space=pltpu.MemorySpace.SMEM),      # PReLU slope scalar
    ]
    args = [p_bf, yw_bf, bias, a_smem]
    if residual is not None:
        in_specs.append(pl.BlockSpec((tm, f_pad), lambda i: (i, 0)))   # residual (f32)
        args.append(residual)

    return pl.pallas_call(
        _make_streamed_kernel(residual is not None),
        out_shape=jax.ShapeDtypeStruct((n_pad, f_pad), out_dtype),
        grid_spec=pltpu.PrefetchScalarGridSpec(
            num_scalar_prefetch=0,
            grid=grid,
            in_specs=in_specs,
            out_specs=pl.BlockSpec((tm, f_pad), lambda i: (i, 0)),
        ),
        compiler_params=pltpu.CompilerParams(
            dimension_semantics=("parallel",),
            vmem_limit_bytes=_streamed_vmem_limit(
                tm, n_pad, f_pad, residual is not None,
                np.dtype(out_dtype).itemsize, vmem_cap),
        ),
    )(*args)


# --------------------------------------------------------------------------------------
# Prepare (hoisted, once per graph/params) + forward.
# --------------------------------------------------------------------------------------
def prepare_layer(P, w1, b1, w2, b2, prelu_a, *, mode="auto"):
    """Pad/cast the static operands once and pick fused vs streamed from VMEM size."""
    P = jnp.asarray(P, jnp.float32)
    N = P.shape[0]
    F = int(np.shape(w1)[0])
    f_pad = _round_up(F, 128)        # keep f_pad = 128: kernel is HBM-bound on P
    cap = _vmem_capacity_bytes()
    n_pad = _round_up(max(N, 1), 128)

    # Fused gate: resident bf16 P + intermediates must fit in half the per-core VMEM
    # (64 MiB on v7x, 128 MiB on v5e/v6e) -> fall back to the streamed path otherwise.
    fused_bytes = 2 * n_pad * n_pad + 16 * n_pad * f_pad * 4 + (1 << 20)
    fused = fused_bytes <= cap // 2
    if mode == "fused":
        fused = True
    elif mode == "streamed":
        fused = False

    tm = None
    if not fused:
        tm = _choose_row_tile(n_pad, cap)
        if tm >= 128:
            n_pad = _round_up(max(N, 1), tm)   # pad N up to the tile (no 128 fallback)

    # bf16-cast BEFORE padding: avoids materialising an extra f32 n_pad^2 copy of P.
    p_bf = jnp.pad(P.astype(jnp.bfloat16), ((0, n_pad - N), (0, n_pad - N)))
    w1_bf = jnp.pad(jnp.asarray(w1, jnp.float32).astype(jnp.bfloat16),
                    ((0, f_pad - F), (0, f_pad - F)))
    w2_bf = jnp.pad(jnp.asarray(w2, jnp.float32).astype(jnp.bfloat16),
                    ((0, f_pad - F), (0, f_pad - F)))
    b1_p = jnp.pad(jnp.asarray(b1, jnp.float32), (0, f_pad - F)).reshape(1, f_pad)
    b2_p = jnp.pad(jnp.asarray(b2, jnp.float32), (0, f_pad - F)).reshape(1, f_pad)
    a_smem = jnp.asarray(prelu_a, jnp.float32).reshape(1)

    return dict(N=N, F=F, n_pad=n_pad, f_pad=f_pad, fused=fused, tm=tm, cap=cap,
                p_bf=p_bf, w1_bf=w1_bf, w2_bf=w2_bf, b1=b1_p, b2=b2_p, a=a_smem)


def hypergraph_structural_layer(x, pre):
    """PReLU(conv2(PReLU(conv1(x))) + x) with conv(y) = P @ (y @ Theta) + bias."""
    N, F = pre["N"], pre["F"]
    n_pad, f_pad = pre["n_pad"], pre["f_pad"]
    x_pad = jnp.pad(jnp.asarray(x, jnp.float32), ((0, n_pad - N), (0, f_pad - F)))
    # Theta-1 applied before propagation as a tiny XLA prologue (zero padding is inert).
    xw1_bf = jnp.dot(x_pad.astype(jnp.bfloat16), pre["w1_bf"],
                     preferred_element_type=jnp.float32).astype(jnp.bfloat16)

    if pre["fused"]:
        out = _fused_forward(pre, xw1_bf, x_pad)
    else:
        tm = pre["tm"]
        # layer 1: output bf16 (it is only the next matmul operand). Padded rows hold
        # PReLU(b1) garbage; P's padded columns are zero so they never reach valid rows.
        y1_bf = _streamed_conv_act(pre["p_bf"], xw1_bf, pre["b1"], pre["a"],
                                   residual=None, out_dtype=jnp.bfloat16,
                                   tm=tm, vmem_cap=pre["cap"])
        yw2_bf = jnp.dot(y1_bf, pre["w2_bf"],
                         preferred_element_type=jnp.float32).astype(jnp.bfloat16)
        # layer 2: residual + final PReLU, output f32.
        out = _streamed_conv_act(pre["p_bf"], yw2_bf, pre["b2"], pre["a"],
                                 residual=x_pad, out_dtype=jnp.float32,
                                 tm=tm, vmem_cap=pre["cap"])
    return out[:N, :F]


# --------------------------------------------------------------------------------------
if __name__ == "__main__":
    hidden_dim, n_heads, dropout = 32, 4, 0.1   # dropout is inert in this forward pass
    N = 8

    key = jax.random.PRNGKey(0)
    kx, k1, k2 = jax.random.split(key, 3)
    x = jax.random.normal(kx, (N, hidden_dim), jnp.float32)

    # graph: two 4-cliques connected by a single bridge edge (3, 4)
    edges = [(0, 1), (0, 2), (0, 3), (1, 2), (1, 3), (2, 3),
             (4, 5), (4, 6), (4, 7), (5, 6), (5, 7), (6, 7), (3, 4)]
    edge_index = np.asarray(edges, np.int64).T                       # (2, 13)

    # build hyperedge incidence exactly as the reference module does (host side)
    hyper = build_hypergraph_from_graph(edge_index, N)               # (2, P)
    E = int(hyper[1].max()) + 1
    H_np = np.zeros((N, E), np.float32)
    np.add.at(H_np, (hyper[0], hyper[1]), 1.0)
    H = jnp.asarray(H_np)

    # deterministic parameter init (Kaiming-normal weights, zero biases, PReLU a=0.25)
    std = (2.0 / hidden_dim) ** 0.5
    w1 = jax.random.normal(k1, (hidden_dim, hidden_dim), jnp.float32) * std
    w2 = jax.random.normal(k2, (hidden_dim, hidden_dim), jnp.float32) * std
    b1 = jnp.zeros((hidden_dim,), jnp.float32)
    b2 = jnp.zeros((hidden_dim,), jnp.float32)
    prelu_a = 0.25

    P = hypergraph_propagation_matrix(H)          # shared by both conv layers

    # fused path (auto-selected at this size: single pallas_call, P read from HBM once)
    pre_fused = prepare_layer(P, w1, b1, w2, b2, prelu_a, mode="auto")
    assert pre_fused["fused"]
    out_fused = jax.block_until_ready(hypergraph_structural_layer(x, pre_fused))
    # streamed fallback path (forced here so both code paths are exercised on-device)
    pre_str = prepare_layer(P, w1, b1, w2, b2, prelu_a, mode="streamed")
    out_str = jax.block_until_ready(hypergraph_structural_layer(x, pre_str))

    out_f = np.asarray(out_fused)
    out_s = np.asarray(out_str)

    # ---- reference 1: exact f64 semantics of the original module ----------------------
    xn = np.asarray(x, np.float64)
    w1n, w2n = np.asarray(w1, np.float64), np.asarray(w2, np.float64)
    b1n, b2n = np.asarray(b1, np.float64), np.asarray(b2, np.float64)
    H64 = H_np.astype(np.float64)
    Dn = H64.sum(1); Dinv = np.where(Dn > 0, 1.0 / Dn, 0.0)[:, None]
    Bn = H64.sum(0); Binv = np.where(Bn > 0, 1.0 / Bn, 0.0)[:, None]

    def conv_ref(z, w, b):
        z = z @ w
        m = Binv * (H64.T @ z)
        y = Dinv * (H64 @ m)
        return y + b

    def prelu_ref(v):
        return np.where(v >= 0, v, prelu_a * v)

    y1_ref = prelu_ref(conv_ref(xn, w1n, b1n))
    ref64 = prelu_ref(conv_ref(y1_ref, w2n, b2n) + xn)
    assert np.allclose(out_f, ref64, atol=5e-2, rtol=5e-2), float(np.abs(out_f - ref64).max())
    assert np.allclose(out_s, ref64, atol=5e-2, rtol=5e-2), float(np.abs(out_s - ref64).max())

    # ---- reference 2: bf16-mirrored math (tight check of the kernel math itself) ------
    bf = lambda t: jnp.asarray(t, jnp.float32).astype(jnp.bfloat16)
    bdot = lambda a, b: jnp.dot(a, b, preferred_element_type=jnp.float32)

    P_bf, x_bf = bf(P), bf(x)
    w1_b, w2_b = bf(w1), bf(w2)
    xw1_q = bdot(x_bf, w1_b).astype(jnp.bfloat16)
    z1 = bdot(P_bf, xw1_q) + b1
    y1_q = jnp.where(z1 >= 0, z1, prelu_a * z1).astype(jnp.bfloat16)
    yw2_q = bdot(y1_q, w2_b).astype(jnp.bfloat16)
    z2 = bdot(P_bf, yw2_q) + b2 + x
    ref_q = np.asarray(jnp.where(z2 >= 0, z2, prelu_a * z2))
    assert np.allclose(out_f, ref_q, atol=2e-3, rtol=2e-3), float(np.abs(out_f - ref_q).max())
    assert np.allclose(out_s, ref_q, atol=2e-3, rtol=2e-3), float(np.abs(out_s - ref_q).max())

    print("KERNEL_OK")
</pallas_src>

<mosaic_0001>
module attributes {stable_mosaic.version = 11 : i64} {
  func.func @_fused_kernel(%arg0: memref<128x128xbf16, #tpu.memory_space<vmem>>, %arg1: memref<128x128xbf16, #tpu.memory_space<vmem>>, %arg2: memref<128x128xf32, #tpu.memory_space<vmem>>, %arg3: memref<128x128xbf16, #tpu.memory_space<vmem>>, %arg4: memref<1x128xf32, #tpu.memory_space<vmem>>, %arg5: memref<1x128xf32, #tpu.memory_space<vmem>>, %arg6: memref<1xf32, #tpu.memory_space<smem>>, %arg7: memref<128x128xf32, #tpu.memory_space<vmem>>) attributes {dimension_semantics = [], scalar_prefetch = 0 : i64, scratch_operands = 0 : i64, tpu.core_type = #tpu.core_type<tc>} {
    %c0 = arith.constant 0 : index
    %0 = memref.load %arg6[%c0] : memref<1xf32, #tpu.memory_space<smem>>
    %c0_0 = arith.constant 0 : index
    %c0_1 = arith.constant 0 : index
    %1 = vector.load %arg0[%c0_0, %c0_1] : memref<128x128xbf16, #tpu.memory_space<vmem>>, vector<128x128xbf16>
    %c0_2 = arith.constant 0 : index
    %c0_3 = arith.constant 0 : index
    %2 = vector.load %arg1[%c0_2, %c0_3] : memref<128x128xbf16, #tpu.memory_space<vmem>>, vector<128x128xbf16>
    %cst = arith.constant dense<0.000000e+00> : vector<128x128xf32>
    %3 = tpu.matmul %1, %2, %cst {dimension_numbers = #tpu.dot_dimension_numbers<[1], [0], [0], [1], [0, 0, 1, 1], [], []>} : vector<128x128xbf16>, vector<128x128xbf16>, vector<128x128xf32> -> vector<128x128xf32>
    %c0_4 = arith.constant 0 : index
    %c0_5 = arith.constant 0 : index
    %4 = vector.load %arg4[%c0_4, %c0_5] : memref<1x128xf32, #tpu.memory_space<vmem>>, vector<1x128xf32>
    %5 = vector.broadcast %4 : vector<1x128xf32> to vector<128x128xf32>
    %6 = arith.addf %3, %5 : vector<128x128xf32>
    %cst_6 = arith.constant 0.000000e+00 : f32
    %7 = vector.broadcast %cst_6 : f32 to vector<128x128xf32>
    %8 = arith.cmpf oge, %6, %7 : vector<128x128xf32>
    %9 = vector.broadcast %0 : f32 to vector<128x128xf32>
    %10 = arith.mulf %9, %6 : vector<128x128xf32>
    %11 = arith.select %8, %6, %10 : vector<128x128xi1>, vector<128x128xf32>
    %12 = arith.truncf %11 : vector<128x128xf32> to vector<128x128xbf16>
    %c0_7 = arith.constant 0 : index
    %c0_8 = arith.constant 0 : index
    %13 = vector.load %arg3[%c0_7, %c0_8] : memref<128x128xbf16, #tpu.memory_space<vmem>>, vector<128x128xbf16>
    %cst_9 = arith.constant dense<0.000000e+00> : vector<128x128xf32>
    %14 = tpu.matmul %12, %13, %cst_9 {dimension_numbers = #tpu.dot_dimension_numbers<[1], [0], [0], [1], [0, 0, 1, 1], [], []>} : vector<128x128xbf16>, vector<128x128xbf16>, vector<128x128xf32> -> vector<128x128xf32>
    %15 = arith.truncf %14 : vector<128x128xf32> to vector<128x128xbf16>
    %c0_10 = arith.constant 0 : index
    %c0_11 = arith.constant 0 : index
    %16 = vector.load %arg0[%c0_10, %c0_11] : memref<128x128xbf16, #tpu.memory_space<vmem>>, vector<128x128xbf16>
    %cst_12 = arith.constant dense<0.000000e+00> : vector<128x128xf32>
    %17 = tpu.matmul %16, %15, %cst_12 {dimension_numbers = #tpu.dot_dimension_numbers<[1], [0], [0], [1], [0, 0, 1, 1], [], []>} : vector<128x128xbf16>, vector<128x128xbf16>, vector<128x128xf32> -> vector<128x128xf32>
    %c0_13 = arith.constant 0 : index
    %c0_14 = arith.constant 0 : index
    %18 = vector.load %arg5[%c0_13, %c0_14] : memref<1x128xf32, #tpu.memory_space<vmem>>, vector<1x128xf32>
    %19 = vector.broadcast %18 : vector<1x128xf32> to vector<128x128xf32>
    %20 = arith.addf %17, %19 : vector<128x128xf32>
    %c0_15 = arith.constant 0 : index
    %c0_16 = arith.constant 0 : index
    %21 = vector.load %arg2[%c0_15, %c0_16] : memref<128x128xf32, #tpu.memory_space<vmem>>, vector<128x128xf32>
    %22 = arith.addf %20, %21 : vector<128x128xf32>
    %cst_17 = arith.constant 0.000000e+00 : f32
    %23 = vector.broadcast %cst_17 : f32 to vector<128x128xf32>
    %24 = arith.cmpf oge, %22, %23 : vector<128x128xf32>
    %25 = vector.broadcast %0 : f32 to vector<128x128xf32>
    %26 = arith.mulf %25, %22 : vector<128x128xf32>
    %27 = arith.select %24, %22, %26 : vector<128x128xi1>, vector<128x128xf32>
    %c0_18 = arith.constant 0 : index
    %c0_19 = arith.constant 0 : index
    %28 = vector.load %arg7[%c0_18, %c0_19] : memref<128x128xf32, #tpu.memory_space<vmem>>, vector<128x128xf32>
    tpu.vector_store %arg7[%c0_18, %c0_19], %27 {strides = array<i32>} : memref<128x128xf32, #tpu.memory_space<vmem>>, vector<128x128xf32>,
    return
  }
}

</mosaic_0001>

<bundles_post_ra>
// kernel: tpu_custom_call.1
= control target key start
LH: loop header
LB: loop body
LE: loop exit
PB: predicated region body
PF: predicated region fallthrough
CT: control target
= control target key end

     0   :  { %13 = vsyncpa [#allocation4], 0  ;;  %s1085_s0 = inlined_call_operand.hbm [shape: bf16[128,128], index: 0, kind: input, shape index: {}]   ;;  %s1086_s1 = inlined_call_operand.hbm [shape: bf16[128,128], index: 1, kind: input, shape index: {}]   ;;  %s1087_s2 = inlined_call_operand.hbm [shape: f32[128,128], index: 2, kind: input, shape index: {}]   ;;  %s1088_s3 = inlined_call_operand.hbm [shape: bf16[128,128], index: 3, kind: input, shape index: {}]   ;;  %s1089_s4 = inlined_call_operand.vmem [shape: f32[1,128], index: 4, kind: input, shape index: {}]   ;;  %s1090_s5 = inlined_call_operand.vmem [shape: f32[1,128], index: 5, kind: input, shape index: {}]   ;;  %s1091_s6 = inlined_call_operand.<no memory space> [shape: f32[1], index: 6, kind: input, shape index: {}]   ;;  %s1092_s7 = inlined_call_operand.hbm [shape: f32[128,128], index: 7, kind: output, shape index: {}]  }
   0x1   :  { %14 = vsyncpa [#allocation7], 0 }
   0x2   :  { %15 = vsyncpa [#allocation10], 0 }
   0x3   :  { %16 = vsyncpa [#allocation5], 0  ;;  %s34_s26 = sshll.u32 %s1086_s1, 4  ;;  %s904_s27 = smov [#allocation6]   ;;  %s35_s26 = int_to_ptr.hbm [resolvable:$true] %s34_s26 }
   0x4   :  { %s36_s28 = sshll.u32 %s904_s27, 4  ;;  %s21_s8 = sshll.u32 %s1085_s0, 4  ;;  %s37_s28 = int_to_ptr.vmem [resolvable:$true] %s36_s28  ;;  %s22_s8 = int_to_ptr.hbm [resolvable:$true] %s21_s8 }
   0x5   :  { %s905_s9 = smov 64   ;;  %s906_s10 = smov 4  }
   0x6   :  { %42 = dma.hbm_to_vmem [thread:$0]  %s35_s26, 1024, %s37_s28, [#allocation7], %s905_s9, %s905_s9, %s906_s10  }
   0x7   :  { %s907_s11 = smov [#allocation3]   ;;  %s47_s15 = sshll.u32 %s1087_s2, 4  ;;  %s48_s15 = int_to_ptr.hbm [resolvable:$true] %s47_s15 }
   0x8   :  { %s23_s12 = sshll.u32 %s907_s11, 4  ;;  %s908_s1 = smov [#allocation8]   ;;  %s24_s12 = int_to_ptr.vmem [resolvable:$true] %s23_s12 }
   0x9   :  { %29 = dma.hbm_to_vmem [thread:$0]  %s22_s8, 1024, %s24_s12, [#allocation4], %s905_s9, %s905_s9, %s906_s10  }
   0xa   :  { %s49_s16 = sshll.u32 %s908_s1, 4  ;;  %s60_s0 = sshll.u32 %s1088_s3, 4  ;;  %s50_s16 = int_to_ptr.vmem [resolvable:$true] %s49_s16  ;;  %s61_s0 = int_to_ptr.hbm [resolvable:$true] %s60_s0 }
   0xb   :  { %s909_s19 = smov 128   ;;  %s910_s20 = smov 8  }
   0xc   :  { %55 = dma.hbm_to_vmem [thread:$0]  %s48_s15, 2048, %s50_s16, [#allocation7], %s909_s19, %s909_s19, %s910_s20  }
   0xd   :  { %s911_s21 = smov [#allocation9]  }
   0xe   :  { %s62_s22 = sshll.u32 %s911_s21, 4  ;;  %s63_s22 = int_to_ptr.vmem [resolvable:$true] %s62_s22 }
   0xf   :  { %68 = dma.hbm_to_vmem [thread:$0]  %s61_s0, 1024, %s63_s22, [#allocation10], %s905_s9, %s905_s9, %s906_s10  }
  0x10   :  { %896 = dma.done.wait [#allocation4], 1024  }
  0x11   :  { %897 = vsyncadd [#allocation4], 4294966272 }
  0x12   :  { %898 = dma.done.wait [#allocation7], 3072  }
  0x13   :  { %899 = vsyncadd [#allocation7], 4294964224 }
  0x14   :  { %900 = dma.done.wait [#allocation10], 1024  }
  0x15   :  { %901 = vsyncadd [#allocation10], 4294966272  ;;  %v732_v0 = vld [vmem:[#allocation6 + $0x38] sm:$0xff]  ;;  %v731_v1 = vld [vmem:[#allocation6 + $0x30] sm:$0xff]  ;;  %v1001_v27 = vstv %s1091_s6  ;;  %s606_s28 = sshll.u32 %s1092_s7, 4  ;;  %s607_s28 = int_to_ptr.hbm [resolvable:$true] %s606_s28 }
  0x16   :  { %224 = vmatpush.bf16.msra.mxu0 %v732_v0  ;;  %741 = vmatpush.bf16.msra.mxu3 %v732_v0  ;;  %v730_v2 = vld [vmem:[#allocation6 + $0x28] sm:$0xff]  ;;  %v729_v3 = vld [vmem:[#allocation6 + $0x20] sm:$0xff]  ;;  %v728_v4 = vld [vmem:[#allocation6 + $0x18] sm:$0xff] }
  0x17   :  { %v727_v5 = vld [vmem:[#allocation6 + $0x10] sm:$0xff]  ;;  %v726_v6 = vld [vmem:[#allocation6 + $0x8] sm:$0xff]  ;;  %v725_v7 = vld [vmem:[#allocation6] sm:$0xff] }
  0x18   :  { %v968_v8 = vld [vmem:[#allocation3] sm:$0xff]  ;;  %v970_v9 = vld [vmem:[#allocation3 + $0x30] sm:$0xff]  ;;  %v974_v10 = vld [vmem:[#allocation3 + $0x8] sm:$0xff] }
  0x19   :  { %v976_v11 = vld [vmem:[#allocation3 + $0x38] sm:$0xff]  ;;  %v980_v12 = vld [vmem:[#allocation3 + $0x10] sm:$0xff]  ;;  %v738_v16 = vld [vmem:[#allocation9 + $0x28] sm:$0xff] }
  0x1a   :  { %225 = vmatpush.bf16.msra.mxu0 %v731_v1  ;;  %742 = vmatpush.bf16.msra.mxu3 %v731_v1  ;;  %v983_v13 = vld [vmem:[#allocation3 + $0x18] sm:$0xff]  ;;  %v739_v15 = vld [vmem:[#allocation9 + $0x30] sm:$0xff]  ;;  %v737_v17 = vld [vmem:[#allocation9 + $0x20] sm:$0xff] }
  0x1b   :  { %v740_v14 = vld [vmem:[#allocation9 + $0x38] sm:$0xff]  ;;  %v986_v18 = vld [vmem:[#allocation3 + $0x20] sm:$0xff]  ;;  %v989_v19 = vld [vmem:[#allocation3 + $0x28] sm:$0xff] }
  0x1c   :  { %394 = vmatpush.bf16.msra.mxu1 %v740_v14  ;;  %v736_v20 = vld [vmem:[#allocation9 + $0x18] sm:$0xff]  ;;  %v735_v21 = vld [vmem:[#allocation9 + $0x10] sm:$0xff]  ;;  %v734_v22 = vld [vmem:[#allocation9 + $0x8] sm:$0xff] }
  0x1d   :  { %v733_v23 = vld [vmem:[#allocation9] sm:$0xff] }
  0x1e   :  { %226 = vmatpush.bf16.msra.mxu0 %v730_v2  ;;  %743 = vmatpush.bf16.msra.mxu3 %v730_v2  ;;  %v995_v25 = vld [vmem:[%s1089_s4] ss:$0 sm:$0xff] }
  0x20   :  { %395 = vmatpush.bf16.msra.mxu1 %v739_v15 }
  0x22   :  { %227 = vmatpush.bf16.msra.mxu0 %v729_v3  ;;  %744 = vmatpush.bf16.msra.mxu3 %v729_v3 }
  0x24   :  { %396 = vmatpush.bf16.msra.mxu1 %v738_v16 }
  0x26   :  { %228 = vmatpush.bf16.msra.mxu0 %v728_v4  ;;  %745 = vmatpush.bf16.msra.mxu3 %v728_v4 }
  0x28   :  { %397 = vmatpush.bf16.msra.mxu1 %v737_v17 }
  0x2a   :  { %229 = vmatpush.bf16.msra.mxu0 %v727_v5  ;;  %746 = vmatpush.bf16.msra.mxu3 %v727_v5 }
  0x2c   :  { %398 = vmatpush.bf16.msra.mxu1 %v736_v20 }
  0x2e   :  { %230 = vmatpush.bf16.msra.mxu0 %v726_v6  ;;  %747 = vmatpush.bf16.msra.mxu3 %v726_v6 }
  0x30   :  { %399 = vmatpush.bf16.msra.mxu1 %v735_v21 }
  0x32   :  { %231 = vmatpush.bf16.msra.mxu0 %v725_v7  ;;  %748 = vmatpush.bf16.msra.mxu3 %v725_v7 }
  0x34   :  { %400 = vmatpush.bf16.msra.mxu1 %v734_v22 }
  0x35   :  { %232 = vmatmul.bf16.vlgmr.msra.gmra.mxu0 %v968_v8  ;;  %262 = vmatmul.bf16.vlgmr.msra.gmra.mxu3 %v970_v9 }
  0x36   :  { %749 = vmatpush.bf16.msrb.mxu3 %v740_v14 }
  0x38   :  { %401 = vmatpush.bf16.msra.mxu1 %v733_v23 }
  0x3a   :  { %750 = vmatpush.bf16.msrb.mxu3 %v739_v15 }
  0x3e   :  { %751 = vmatpush.bf16.msrb.mxu3 %v738_v16 }
  0x42   :  { %752 = vmatpush.bf16.msrb.mxu3 %v737_v17 }
  0x45   :  { %237 = vmatmul.bf16.gmra.mxu0 %v974_v10  ;;  %267 = vmatmul.bf16.gmra.mxu3 %v976_v11 }
  0x46   :  { %753 = vmatpush.bf16.msrb.mxu3 %v736_v20 }
  0x4a   :  { %754 = vmatpush.bf16.msrb.mxu3 %v735_v21 }
  0x4e   :  { %755 = vmatpush.bf16.msrb.mxu3 %v734_v22 }
  0x52   :  { %756 = vmatpush.bf16.msrb.mxu3 %v733_v23 }
  0x55   :  { %242 = vmatmul.bf16.gmra.mxu0 %v980_v12 }
  0x65   :  { %247 = vmatmul.bf16.gmra.mxu0 %v983_v13 }
  0x75   :  { %252 = vmatmul.bf16.gmra.mxu0 %v986_v18 }
  0x85   :  { %257 = vmatmul.bf16.gmra.mxu0 %v989_v19 }
  0xb2   :  { %v233_v24 = vpop.f32.mrf.mxu0 }
  0xb3   :  { %v234_v26 = vadd.f32 %v995_v25, %v233_v24 }
  0xb5   :  { %v290_v30 = vmul.f32 %v1001_v27, %v234_v26  ;;  %vm273_vm0 = vcmp.ge.f32.partialorder %v234_v26, 0.0 }
  0xb7   :  { %v306_v35 = vsel %vm273_vm0, %v234_v26, %v290_v30 }
  0xb8   :  { %v263_v28 = vpop.f32.mrf.mxu3 }
  0xb9   :  { %v264_v32 = vadd.f32 %v995_v25, %v263_v28 }
  0xba   :  { %v235_v29 = vpop.f32.mrf.mxu0 }
  0xbb   :  { %v236_v31 = vadd.f32 %v995_v25, %v235_v29  ;;  %v302_v34 = vmul.f32 %v1001_v27, %v264_v32  ;;  %vm285_vm2 = vcmp.ge.f32.partialorder %v264_v32, 0.0 }
  0xbd   :  { %v291_v33 = vmul.f32 %v1001_v27, %v236_v31  ;;  %vm274_vm1 = vcmp.ge.f32.partialorder %v236_v31, 0.0  ;;  %v318_v42 = vsel %vm285_vm2, %v264_v32, %v302_v34 }
  0xbf   :  { %v307_v36 = vsel %vm274_vm1, %v236_v31, %v291_v33 }
  0xc0   :  { %v322_v37 = vpack.c.bf16 %v307_v36, %v306_v35  ;;  %v265_v38 = vpop.f32.mrf.mxu3 }
  0xc1   :  { %v266_v39 = vadd.f32 %v995_v25, %v265_v38 }
  0xc2   :  { %v238_v40 = vpop.f32.mrf.mxu0  ;;  %402 = vmatmul.bf16.vlgmr.msra.gmra.mxu1 %v322_v37 }
  0xc3   :  { %vm286_vm3 = vcmp.ge.f32.partialorder %v266_v39, 0.0  ;;  %v303_v41 = vmul.f32 %v1001_v27, %v266_v39  ;;  %v239_v45 = vadd.f32 %v995_v25, %v238_v40 }
  0xc5   :  { %v319_v43 = vsel %vm286_vm3, %v266_v39, %v303_v41  ;;  %v292_v48 = vmul.f32 %v1001_v27, %v239_v45  ;;  %vm275_vm4 = vcmp.ge.f32.partialorder %v239_v45, 0.0 }
  0xc6   :  { %v328_v44 = vpack.c.bf16 %v319_v43, %v318_v42 }
  0xc7   :  { %v308_v53 = vsel %vm275_vm4, %v239_v45, %v292_v48 }
  0xc8   :  { %v268_v46 = vpop.f32.mrf.mxu3  ;;  %432 = vmatmul.bf16.vlgmr.msrb.gmra.mxu3 %v328_v44 }
  0xc9   :  { %v269_v50 = vadd.f32 %v995_v25, %v268_v46 }
  0xca   :  { %v240_v47 = vpop.f32.mrf.mxu0 }
  0xcb   :  { %v241_v49 = vadd.f32 %v995_v25, %v240_v47  ;;  %v304_v52 = vmul.f32 %v1001_v27, %v269_v50  ;;  %vm287_vm6 = vcmp.ge.f32.partialorder %v269_v50, 0.0 }
  0xcd   :  { %v293_v51 = vmul.f32 %v1001_v27, %v241_v49  ;;  %vm276_vm5 = vcmp.ge.f32.partialorder %v241_v49, 0.0  ;;  %v320_v60 = vsel %vm287_vm6, %v269_v50, %v304_v52 }
  0xcf   :  { %v309_v54 = vsel %vm276_vm5, %v241_v49, %v293_v51 }
  0xd0   :  { %v323_v55 = vpack.c.bf16 %v309_v54, %v308_v53  ;;  %v270_v56 = vpop.f32.mrf.mxu3 }
  0xd1   :  { %v271_v57 = vadd.f32 %v995_v25, %v270_v56 }
  0xd2   :  { %v243_v58 = vpop.f32.mrf.mxu0  ;;  %407 = vmatmul.bf16.gmra.mxu1 %v323_v55 }
  0xd3   :  { %v305_v59 = vmul.f32 %v1001_v27, %v271_v57  ;;  %vm288_vm7 = vcmp.ge.f32.partialorder %v271_v57, 0.0  ;;  %v244_v63 = vadd.f32 %v995_v25, %v243_v58 }
  0xd5   :  { %v321_v61 = vsel %vm288_vm7, %v271_v57, %v305_v59  ;;  %v294_v1 = vmul.f32 %v1001_v27, %v244_v63  ;;  %vm277_vm8 = vcmp.ge.f32.partialorder %v244_v63, 0.0 }
  0xd6   :  { %v329_v62 = vpack.c.bf16 %v321_v61, %v320_v60 }
  0xd7   :  { %v310_v4 = vsel %vm277_vm8, %v244_v63, %v294_v1 }
  0xd8   :  { %437 = vmatmul.bf16.gmra.mxu3 %v329_v62 }
  0xda   :  { %v245_v0 = vpop.f32.mrf.mxu0 }
  0xdb   :  { %v246_v2 = vadd.f32 %v995_v25, %v245_v0 }
  0xdd   :  { %v295_v3 = vmul.f32 %v1001_v27, %v246_v2  ;;  %vm278_vm9 = vcmp.ge.f32.partialorder %v246_v2, 0.0 }
  0xdf   :  { %v311_v5 = vsel %vm278_vm9, %v246_v2, %v295_v3  ;;  %v1045_v3 = vld [vmem:[%s1090_s5] ss:$0 sm:$0xff]  ;;  %s912_s5 = smov [#allocation11]  }
  0xe0   :  { %v324_v6 = vpack.c.bf16 %v311_v5, %v310_v4  ;;  %v504_v4 = vld [vmem:[#allocation8] sm:$0xff]  ;;  %v505_v5 = vld [vmem:[#allocation8 + $0x8] sm:$0xff]  ;;  %s604_s25 = sshll.u32 %s912_s5, 4  ;;  %s605_s25 = int_to_ptr.vmem [resolvable:$true] %s604_s25 }
  0xe2   :  { %v248_v7 = vpop.f32.mrf.mxu0  ;;  %412 = vmatmul.bf16.gmra.mxu1 %v324_v6 }
  0xe3   :  { %v249_v14 = vadd.f32 %v995_v25, %v248_v7 }
  0xe5   :  { %v296_v16 = vmul.f32 %v1001_v27, %v249_v14  ;;  %vm279_vm10 = vcmp.ge.f32.partialorder %v249_v14, 0.0 }
  0xe7   :  { %v312_v21 = vsel %vm279_vm10, %v249_v14, %v296_v16 }
  0xea   :  { %v250_v15 = vpop.f32.mrf.mxu0 }
  0xeb   :  { %v251_v17 = vadd.f32 %v995_v25, %v250_v15  ;;  %v506_v15 = vld [vmem:[#allocation8 + $0x10] sm:$0xff] }
  0xed   :  { %v297_v20 = vmul.f32 %v1001_v27, %v251_v17  ;;  %vm280_vm11 = vcmp.ge.f32.partialorder %v251_v17, 0.0 }
  0xef   :  { %v313_v22 = vsel %vm280_vm11, %v251_v17, %v297_v20 }
  0xf0   :  { %v325_v23 = vpack.c.bf16 %v313_v22, %v312_v21 }
  0xf2   :  { %v253_v24 = vpop.f32.mrf.mxu0  ;;  %417 = vmatmul.bf16.gmra.mxu1 %v325_v23 }
  0xf3   :  { %v254_v26 = vadd.f32 %v995_v25, %v253_v24  ;;  %v507_v24 = vld [vmem:[#allocation8 + $0x18] sm:$0xff] }
  0xf5   :  { %v298_v29 = vmul.f32 %v1001_v27, %v254_v26  ;;  %vm281_vm12 = vcmp.ge.f32.partialorder %v254_v26, 0.0 }
  0xf7   :  { %v314_v32 = vsel %vm281_vm12, %v254_v26, %v298_v29 }
  0xfa   :  { %v255_v28 = vpop.f32.mrf.mxu0 }
  0xfb   :  { %v256_v30 = vadd.f32 %v995_v25, %v255_v28  ;;  %v516_v28 = vld [vmem:[#allocation8 + $0x60] sm:$0xff] }
  0xfd   :  { %v299_v31 = vmul.f32 %v1001_v27, %v256_v30  ;;  %vm282_vm13 = vcmp.ge.f32.partialorder %v256_v30, 0.0 }
  0xff   :  { %v315_v33 = vsel %vm282_vm13, %v256_v30, %v299_v31 }
 0x100   :  { %v326_v34 = vpack.c.bf16 %v315_v33, %v314_v32 }
 0x102   :  { %v258_v35 = vpop.f32.mrf.mxu0  ;;  %422 = vmatmul.bf16.gmra.mxu1 %v326_v34 }
 0x103   :  { %v259_v36 = vadd.f32 %v995_v25, %v258_v35 }
 0x105   :  { %v300_v38 = vmul.f32 %v1001_v27, %v259_v36  ;;  %vm283_vm14 = vcmp.ge.f32.partialorder %v259_v36, 0.0 }
 0x107   :  { %v316_v41 = vsel %vm283_vm14, %v259_v36, %v300_v38 }
 0x10a   :  { %v260_v37 = vpop.f32.mrf.mxu0 }
 0x10b   :  { %v261_v39 = vadd.f32 %v995_v25, %v260_v37 }
 0x10d   :  { %v301_v40 = vmul.f32 %v1001_v27, %v261_v39  ;;  %vm284_vm15 = vcmp.ge.f32.partialorder %v261_v39, 0.0 }
 0x10f   :  { %v317_v42 = vsel %vm284_vm15, %v261_v39, %v301_v40  ;;  %v508_v39 = vld [vmem:[#allocation8 + $0x20] sm:$0xff]  ;;  %v517_v40 = vld [vmem:[#allocation8 + $0x68] sm:$0xff] }
 0x110   :  { %v327_v43 = vpack.c.bf16 %v317_v42, %v316_v41 }
 0x112   :  { %427 = vmatmul.bf16.gmra.mxu1 %v327_v43 }
 0x13f   :  { %v403_v44 = vpop.f32.mrf.mxu1 }
 0x147   :  { %v405_v45 = vpop.f32.mrf.mxu1 }
 0x148   :  { %v443_v46 = vpack.c.bf16 %v405_v45, %v403_v44 }
 0x14b   :  { %v433_v47 = vpop.f32.mrf.mxu3 }
 0x14f   :  { %v408_v48 = vpop.f32.mrf.mxu1 }
 0x153   :  { %v435_v49 = vpop.f32.mrf.mxu3 }
 0x154   :  { %v449_v55 = vpack.c.bf16 %v435_v49, %v433_v47 }
 0x157   :  { %v410_v50 = vpop.f32.mrf.mxu1 }
 0x158   :  { %v444_v51 = vpack.c.bf16 %v410_v50, %v408_v48  ;;  %v509_v50 = vld [vmem:[#allocation8 + $0x28] sm:$0xff] }
 0x15b   :  { %v438_v52 = vpop.f32.mrf.mxu3 }
 0x15f   :  { %v413_v53 = vpop.f32.mrf.mxu1 }
 0x163   :  { %v440_v54 = vpop.f32.mrf.mxu3 }
 0x164   :  { %v450_v25 = vpack.c.bf16 %v440_v54, %v438_v52  ;;  %v518_v52 = vld [vmem:[#allocation8 + $0x70] sm:$0xff] }
 0x166   :  { %455 = vmatpush.bf16.msra.mxu2 %v450_v25  ;;  %757 = vmatpush.bf16.msra.mxu3 %v450_v25 }
 0x167   :  { %v415_v56 = vpop.f32.mrf.mxu1 }
 0x168   :  { %v445_v2 = vpack.c.bf16 %v415_v56, %v413_v53 }
 0x16a   :  { %456 = vmatpush.bf16.msra.mxu2 %v449_v55  ;;  %758 = vmatpush.bf16.msra.mxu3 %v449_v55 }
 0x16f   :  { %v418_v57 = vpop.f32.mrf.mxu1 }
 0x177   :  { %v420_v58 = vpop.f32.mrf.mxu1 }
 0x178   :  { %v446_v1 = vpack.c.bf16 %v420_v58, %v418_v57 }
 0x17f   :  { %v423_v59 = vpop.f32.mrf.mxu1 }
 0x187   :  { %v425_v60 = vpop.f32.mrf.mxu1 }
 0x188   :  { %v447_v0 = vpack.c.bf16 %v425_v60, %v423_v59 }
 0x18f   :  { %v428_v61 = vpop.f32.mrf.mxu1 }
 0x197   :  { %v430_v62 = vpop.f32.mrf.mxu1 }
 0x198   :  { %v448_v63 = vpack.c.bf16 %v430_v62, %v428_v61  ;;  %v510_v62 = vld [vmem:[#allocation8 + $0x30] sm:$0xff] }
 0x19a   :  { %457 = vmatpush.bf16.msra.mxu2 %v448_v63  ;;  %759 = vmatpush.bf16.msra.mxu3 %v448_v63  ;;  %v519_v63 = vld [vmem:[#allocation8 + $0x78] sm:$0xff] }
 0x19e   :  { %458 = vmatpush.bf16.msra.mxu2 %v447_v0  ;;  %760 = vmatpush.bf16.msra.mxu3 %v447_v0 }
 0x1a2   :  { %459 = vmatpush.bf16.msra.mxu2 %v446_v1  ;;  %761 = vmatpush.bf16.msra.mxu3 %v446_v1 }
 0x1a6   :  { %460 = vmatpush.bf16.msra.mxu2 %v445_v2  ;;  %762 = vmatpush.bf16.msra.mxu3 %v445_v2 }
 0x1aa   :  { %461 = vmatpush.bf16.msra.mxu2 %v444_v51  ;;  %763 = vmatpush.bf16.msra.mxu3 %v444_v51 }
 0x1ae   :  { %462 = vmatpush.bf16.msra.mxu2 %v443_v46  ;;  %764 = vmatpush.bf16.msra.mxu3 %v443_v46 }
 0x1b1   :  { %463 = vmatmul.bf16.vlgmr.msra.gmra.mxu2 %v968_v8  ;;  %493 = vmatmul.bf16.vlgmr.msra.gmra.mxu3 %v970_v9 }
 0x1c1   :  { %468 = vmatmul.bf16.gmra.mxu2 %v974_v10  ;;  %498 = vmatmul.bf16.gmra.mxu3 %v976_v11 }
 0x1d1   :  { %473 = vmatmul.bf16.gmra.mxu2 %v980_v12 }
 0x1e1   :  { %478 = vmatmul.bf16.gmra.mxu2 %v983_v13 }
 0x1f1   :  { %483 = vmatmul.bf16.gmra.mxu2 %v986_v18 }
 0x201   :  { %488 = vmatmul.bf16.gmra.mxu2 %v989_v19 }
 0x234   :  { %v464_v8 = vpop.f32.mrf.mxu2  ;;  %v494_v21 = vpop.f32.mrf.mxu3 }
 0x235   :  { %v465_v9 = vadd.f32 %v1045_v3, %v464_v8  ;;  %v495_v26 = vadd.f32 %v1045_v3, %v494_v21  ;;  %v513_v21 = vld [vmem:[#allocation8 + $0x48] sm:$0xff] }
 0x237   :  { %v520_v10 = vadd.f32 %v504_v4, %v465_v9  ;;  %v532_v30 = vadd.f32 %v516_v28, %v495_v26 }
 0x239   :  { %vm536_vm0 = vcmp.ge.f32.partialorder %v520_v10, 0.0  ;;  %v552_v11 = vmul.f32 %v520_v10, %v1001_v27  ;;  %vm548_vm3 = vcmp.ge.f32.partialorder %v532_v30, 0.0  ;;  %v564_v32 = vmul.f32 %v532_v30, %v1001_v27 }
 0x23b   :  { %v568_v12 = vsel %vm536_vm0, %v520_v10, %v552_v11  ;;  %v580_v34 = vsel %vm548_vm3, %v532_v30, %v564_v32 }
 0x23c   :  { %584 = vst [vmem:[#allocation11] sm:$0xff] %v568_v12  ;;  %v466_v13 = vpop.f32.mrf.mxu2  ;;  %v496_v35 = vpop.f32.mrf.mxu3  ;;  %v511_v12 = vld [vmem:[#allocation8 + $0x38] sm:$0xff] }
 0x23d   :  { %v467_v18 = vadd.f32 %v1045_v3, %v466_v13  ;;  %596 = vst [vmem:[#allocation11 + $0x60] sm:$0xff] %v580_v34  ;;  %v497_v37 = vadd.f32 %v1045_v3, %v496_v35  ;;  %v515_v35 = vld [vmem:[#allocation8 + $0x58] sm:$0xff] }
 0x23f   :  { %v521_v19 = vadd.f32 %v505_v5, %v467_v18  ;;  %v533_v42 = vadd.f32 %v517_v40, %v497_v37 }
 0x241   :  { %vm537_vm1 = vcmp.ge.f32.partialorder %v521_v19, 0.0  ;;  %v553_v6 = vmul.f32 %v521_v19, %v1001_v27  ;;  %vm549_vm5 = vcmp.ge.f32.partialorder %v533_v42, 0.0  ;;  %v565_v44 = vmul.f32 %v533_v42, %v1001_v27 }
 0x243   :  { %v569_v7 = vsel %vm537_vm1, %v521_v19, %v553_v6  ;;  %v581_v46 = vsel %vm549_vm5, %v533_v42, %v565_v44 }
 0x244   :  { %585 = vst [vmem:[#allocation11 + $0x8] sm:$0xff] %v569_v7  ;;  %v469_v14 = vpop.f32.mrf.mxu2  ;;  %v499_v47 = vpop.f32.mrf.mxu3  ;;  %v512_v7 = vld [vmem:[#allocation8 + $0x40] sm:$0xff] }
 0x245   :  { %v470_v16 = vadd.f32 %v1045_v3, %v469_v14  ;;  %597 = vst [vmem:[#allocation11 + $0x68] sm:$0xff] %v581_v46  ;;  %v500_v51 = vadd.f32 %v1045_v3, %v499_v47 }
 0x247   :  { %v522_v17 = vadd.f32 %v506_v15, %v470_v16  ;;  %v534_v54 = vadd.f32 %v518_v52, %v500_v51 }
 0x249   :  { %vm538_vm2 = vcmp.ge.f32.partialorder %v522_v17, 0.0  ;;  %v554_v20 = vmul.f32 %v522_v17, %v1001_v27  ;;  %vm550_vm7 = vcmp.ge.f32.partialorder %v534_v54, 0.0  ;;  %v566_v55 = vmul.f32 %v534_v54, %v1001_v27 }
 0x24b   :  { %v570_v22 = vsel %vm538_vm2, %v522_v17, %v554_v20  ;;  %v582_v57 = vsel %vm550_vm7, %v534_v54, %v566_v55 }
 0x24c   :  { %586 = vst [vmem:[#allocation11 + $0x10] sm:$0xff] %v570_v22  ;;  %v471_v23 = vpop.f32.mrf.mxu2  ;;  %v501_v58 = vpop.f32.mrf.mxu3 }
 0x24d   :  { %v472_v29 = vadd.f32 %v1045_v3, %v471_v23  ;;  %598 = vst [vmem:[#allocation11 + $0x70] sm:$0xff] %v582_v57  ;;  %v502_v60 = vadd.f32 %v1045_v3, %v501_v58 }
 0x24f   :  { %v523_v31 = vadd.f32 %v507_v24, %v472_v29  ;;  %v535_v1 = vadd.f32 %v519_v63, %v502_v60  ;;  %v514_v29 = vld [vmem:[#allocation8 + $0x50] sm:$0xff] }
 0x251   :  { %vm539_vm4 = vcmp.ge.f32.partialorder %v523_v31, 0.0  ;;  %v555_v33 = vmul.f32 %v523_v31, %v1001_v27  ;;  %vm551_vm9 = vcmp.ge.f32.partialorder %v535_v1, 0.0  ;;  %v567_v8 = vmul.f32 %v535_v1, %v1001_v27 }
 0x253   :  { %v571_v36 = vsel %vm539_vm4, %v523_v31, %v555_v33  ;;  %v583_v9 = vsel %vm551_vm9, %v535_v1, %v567_v8 }
 0x254   :  { %587 = vst [vmem:[#allocation11 + $0x18] sm:$0xff] %v571_v36  ;;  %v474_v38 = vpop.f32.mrf.mxu2 }
 0x255   :  { %v475_v41 = vadd.f32 %v1045_v3, %v474_v38  ;;  %599 = vst [vmem:[#allocation11 + $0x78] sm:$0xff] %v583_v9 }
 0x257   :  { %v524_v43 = vadd.f32 %v508_v39, %v475_v41 }
 0x259   :  { %vm540_vm6 = vcmp.ge.f32.partialorder %v524_v43, 0.0  ;;  %v556_v45 = vmul.f32 %v524_v43, %v1001_v27 }
 0x25b   :  { %v572_v48 = vsel %vm540_vm6, %v524_v43, %v556_v45 }
 0x25c   :  { %588 = vst [vmem:[#allocation11 + $0x20] sm:$0xff] %v572_v48  ;;  %v476_v49 = vpop.f32.mrf.mxu2 }
 0x25d   :  { %v477_v53 = vadd.f32 %v1045_v3, %v476_v49 }
 0x25f   :  { %v525_v25 = vadd.f32 %v509_v50, %v477_v53 }
 0x261   :  { %vm541_vm8 = vcmp.ge.f32.partialorder %v525_v25, 0.0  ;;  %v557_v56 = vmul.f32 %v525_v25, %v1001_v27 }
 0x263   :  { %v573_v59 = vsel %vm541_vm8, %v525_v25, %v557_v56 }
 0x264   :  { %589 = vst [vmem:[#allocation11 + $0x28] sm:$0xff] %v573_v59  ;;  %v479_v61 = vpop.f32.mrf.mxu2 }
 0x265   :  { %v480_v0 = vadd.f32 %v1045_v3, %v479_v61 }
 0x267   :  { %v526_v2 = vadd.f32 %v510_v62, %v480_v0 }
 0x269   :  { %vm542_vm10 = vcmp.ge.f32.partialorder %v526_v2, 0.0  ;;  %v558_v4 = vmul.f32 %v526_v2, %v1001_v27 }
 0x26b   :  { %v574_v10 = vsel %vm542_vm10, %v526_v2, %v558_v4 }
 0x26c   :  { %590 = vst [vmem:[#allocation11 + $0x30] sm:$0xff] %v574_v10  ;;  %v481_v11 = vpop.f32.mrf.mxu2 }
 0x26d   :  { %v482_v13 = vadd.f32 %v1045_v3, %v481_v11 }
 0x26f   :  { %v527_v5 = vadd.f32 %v511_v12, %v482_v13 }
 0x271   :  { %vm543_vm11 = vcmp.ge.f32.partialorder %v527_v5, 0.0  ;;  %v559_v18 = vmul.f32 %v527_v5, %v1001_v27 }
 0x273   :  { %v575_v19 = vsel %vm543_vm11, %v527_v5, %v559_v18 }
 0x274   :  { %591 = vst [vmem:[#allocation11 + $0x38] sm:$0xff] %v575_v19  ;;  %v484_v6 = vpop.f32.mrf.mxu2 }
 0x275   :  { %v485_v14 = vadd.f32 %v1045_v3, %v484_v6 }
 0x277   :  { %v528_v15 = vadd.f32 %v512_v7, %v485_v14 }
 0x279   :  { %vm544_vm12 = vcmp.ge.f32.partialorder %v528_v15, 0.0  ;;  %v560_v16 = vmul.f32 %v528_v15, %v1001_v27 }
 0x27b   :  { %v576_v17 = vsel %vm544_vm12, %v528_v15, %v560_v16 }
 0x27c   :  { %592 = vst [vmem:[#allocation11 + $0x40] sm:$0xff] %v576_v17  ;;  %v486_v20 = vpop.f32.mrf.mxu2 }
 0x27d   :  { %v487_v22 = vadd.f32 %v1045_v3, %v486_v20 }
 0x27f   :  { %v529_v23 = vadd.f32 %v513_v21, %v487_v22 }
 0x281   :  { %vm545_vm13 = vcmp.ge.f32.partialorder %v529_v23, 0.0  ;;  %v561_v24 = vmul.f32 %v529_v23, %v1001_v27 }
 0x283   :  { %v577_v26 = vsel %vm545_vm13, %v529_v23, %v561_v24 }
 0x284   :  { %593 = vst [vmem:[#allocation11 + $0x48] sm:$0xff] %v577_v26  ;;  %v489_v28 = vpop.f32.mrf.mxu2 }
 0x285   :  { %v490_v30 = vadd.f32 %v1045_v3, %v489_v28 }
 0x287   :  { %v530_v31 = vadd.f32 %v514_v29, %v490_v30 }
 0x289   :  { %vm546_vm14 = vcmp.ge.f32.partialorder %v530_v31, 0.0  ;;  %v562_v32 = vmul.f32 %v530_v31, %v1001_v27 }
 0x28b   :  { %v578_v33 = vsel %vm546_vm14, %v530_v31, %v562_v32 }
 0x28c   :  { %594 = vst [vmem:[#allocation11 + $0x50] sm:$0xff] %v578_v33  ;;  %v491_v34 = vpop.f32.mrf.mxu2 }
 0x28d   :  { %v492_v36 = vadd.f32 %v1045_v3, %v491_v34 }
 0x28f   :  { %v531_v37 = vadd.f32 %v515_v35, %v492_v36 }
 0x291   :  { %vm547_vm15 = vcmp.ge.f32.partialorder %v531_v37, 0.0  ;;  %v563_v38 = vmul.f32 %v531_v37, %v1001_v27 }
 0x293   :  { %v579_v39 = vsel %vm547_vm15, %v531_v37, %v563_v38 }
 0x294   :  { %595 = vst [vmem:[#allocation11 + $0x58] sm:$0xff] %v579_v39 }
 0x295   :  { %612 = dma.vmem_to_hbm [thread:$0]  %s605_s25, 2048, %s607_s28, [#allocation5], %s909_s19, %s909_s19, %s910_s20  }
 0x296   :  { %902 = dma.done.wait [#allocation5], 2048  }
 0x297   :  { %903 = vsyncadd [#allocation5], 4294965248 }
 0x298   :  { %617 = vsyncpa [#allocation4], 1 }
 0x299   :  { %618 = vsyncpa [#allocation7], 1 }
 0x29a   :  { %619 = vsyncpa [#allocation10], 1 }
 0x29b   :  { %620 = vsyncpa [#allocation5], 1 }

</bundles_post_ra>
